<compile_context>
chip_gen: v7x
topology: tpu7x:2x2x1
jax: 0.10.0
libtpu: 0.0.40
codegen_flags: <defaults>
</compile_context>

<pallas_src>
import functools

import jax
import jax.numpy as jnp
from jax.experimental import pallas as pl
from jax.experimental.pallas import tpu as pltpu

LANE = 128


def _round_up(n, m):
    return (n + m - 1) // m * m


def mlp_kernel(x_ref, w1_ref, b1_ref, w2_ref, b2_ref, w3_ref, b3_ref, o_ref,
               *, out_sz):
    # fc1 + ReLU (bf16 MXU operands, f32 accumulation, f32 VPU math)
    h1 = jnp.dot(x_ref[...], w1_ref[...], preferred_element_type=jnp.float32)
    h1 = jnp.maximum(h1 + b1_ref[...], 0.0)
    # fc2 + ReLU
    h2 = jnp.dot(h1.astype(jnp.bfloat16), w2_ref[...],
                 preferred_element_type=jnp.float32)
    h2 = jnp.maximum(h2 + b2_ref[...], 0.0)
    # fc3 (lane-padded to 128 output lanes)
    logits = jnp.dot(h2.astype(jnp.bfloat16), w3_ref[...],
                     preferred_element_type=jnp.float32)
    logits = logits + b3_ref[...]
    # Mask padded lanes to -inf so they do not perturb max / logsumexp.
    col = jax.lax.broadcasted_iota(jnp.int32, logits.shape, 1)
    logits = jnp.where(col < out_sz, logits, -jnp.inf)
    # Numerically stable log_softmax over the last axis.
    m = jnp.max(logits, axis=-1, keepdims=True)
    shifted = logits - m
    lse = jnp.log(jnp.sum(jnp.exp(shifted), axis=-1, keepdims=True))
    o_ref[...] = (shifted - lse).astype(o_ref.dtype)


def mlp_forward(x, padded_params, *, out_sz=10, tb=None):
    """x: (B, in_sz) f32.  padded_params: lane-padded bf16 weights / f32 biases."""
    w1, b1, w2, b2, w3, b3 = padded_params
    B, in_sz = x.shape
    out_pad = w3.shape[1]

    # Batch tile: multiple of 8 sublanes; cap at 256 (MXU height on v6e/v7x)
    # which keeps double-buffered x/out tiles well under v7x's 64 MiB VMEM.
    if tb is None:
        tb = min(256, _round_up(B, 8))
    b_pad = _round_up(B, tb)
    if b_pad != B:
        x = jnp.pad(x, ((0, b_pad - B), (0, 0)))
    x = x.astype(jnp.bfloat16)  # halve x DMA bytes; MXU runs in bf16 anyway

    def resident(shape):
        nd = len(shape)
        return pl.BlockSpec(shape, lambda i, _nd=nd: (0,) * _nd)

    out = pl.pallas_call(
        functools.partial(mlp_kernel, out_sz=out_sz),
        out_shape=jax.ShapeDtypeStruct((b_pad, out_pad), jnp.float32),
        grid_spec=pltpu.PrefetchScalarGridSpec(
            num_scalar_prefetch=0,
            grid=(b_pad // tb,),
            in_specs=[
                pl.BlockSpec((tb, in_sz), lambda i: (i, 0)),
                resident(w1.shape), resident(b1.shape),
                resident(w2.shape), resident(b2.shape),
                resident(w3.shape), resident(b3.shape),
            ],
            out_specs=pl.BlockSpec((tb, out_pad), lambda i: (i, 0)),
        ),
        compiler_params=pltpu.CompilerParams(
            dimension_semantics=("parallel",),
        ),
    )(x, w1, b1, w2, b2, w3, b3)
    return out[:B, :out_sz]


def init_params(key, in_sz=784, out_sz=10, layers=(120, 84)):
    """Deterministic init mimicking nn.Linear's default (uniform +/- 1/sqrt(fan_in))."""
    dims = [(in_sz, layers[0]), (layers[0], layers[1]), (layers[1], out_sz)]
    params = []
    for fan_in, fan_out in dims:
        key, kw, kb = jax.random.split(key, 3)
        bound = 1.0 / jnp.sqrt(fan_in)
        w = jax.random.uniform(kw, (fan_in, fan_out), jnp.float32, -bound, bound)
        b = jax.random.uniform(kb, (1, fan_out), jnp.float32, -bound, bound)
        params += [w, b]
    return tuple(params)


def prepare_params(params):
    """Zero-pad hidden/output dims to 128 lanes; weights -> bf16, biases stay f32."""
    w1, b1, w2, b2, w3, b3 = params
    in_sz = w1.shape[0]
    h1p = _round_up(w1.shape[1], LANE)
    h2p = _round_up(w2.shape[1], LANE)
    outp = _round_up(w3.shape[1], LANE)

    def pad2(a, rows, cols):
        return jnp.pad(a, ((0, rows - a.shape[0]), (0, cols - a.shape[1])))

    return (
        pad2(w1, in_sz, h1p).astype(jnp.bfloat16), pad2(b1, 1, h1p),
        pad2(w2, h1p, h2p).astype(jnp.bfloat16),  pad2(b2, 1, h2p),
        pad2(w3, h2p, outp).astype(jnp.bfloat16), pad2(b3, 1, outp),
    )


def reference_forward_f32(x, params):
    """Plain-JAX f32 reference matching the PyTorch module semantics."""
    w1, b1, w2, b2, w3, b3 = params
    h1 = jnp.maximum(x @ w1 + b1, 0.0)
    h2 = jnp.maximum(h1 @ w2 + b2, 0.0)
    logits = h2 @ w3 + b3
    return jax.nn.log_softmax(logits, axis=1)


def reference_forward_matched(x, padded_params, out_sz=10):
    """Plain-JAX reference with the same bf16-operand / f32-accumulate numerics."""
    w1, b1, w2, b2, w3, b3 = padded_params
    xb = x.astype(jnp.bfloat16)
    h1 = jnp.maximum(
        jnp.dot(xb, w1, preferred_element_type=jnp.float32) + b1, 0.0)
    h2 = jnp.maximum(
        jnp.dot(h1.astype(jnp.bfloat16), w2, preferred_element_type=jnp.float32) + b2, 0.0)
    logits = jnp.dot(h2.astype(jnp.bfloat16), w3,
                     preferred_element_type=jnp.float32) + b3
    logits = logits[:, :out_sz]
    return jax.nn.log_softmax(logits, axis=1)


if __name__ == "__main__":
    key = jax.random.PRNGKey(0)
    k_params, k_x1, k_x2 = jax.random.split(key, 3)

    in_sz, out_sz, layers = 784, 10, (120, 84)
    params = init_params(k_params, in_sz, out_sz, layers)
    padded = prepare_params(params)

    # Test 1: small batch (single tile).
    x_small = jax.random.normal(k_x1, (8, in_sz), dtype=jnp.float32)
    out_small = jax.block_until_ready(mlp_forward(x_small, padded, out_sz=out_sz))
    assert out_small.shape == (8, out_sz)
    assert jnp.allclose(out_small, reference_forward_matched(x_small, padded, out_sz),
                        atol=1e-3, rtol=1e-3)
    assert jnp.allclose(out_small, reference_forward_f32(x_small, params),
                        atol=5e-2, rtol=5e-2)

    # Test 2: multi-tile grid with batch padding (B=300 -> TB=256, grid=(2,)).
    x_big = jax.random.normal(k_x2, (300, in_sz), dtype=jnp.float32)
    out_big = jax.block_until_ready(mlp_forward(x_big, padded, out_sz=out_sz))
    assert out_big.shape == (300, out_sz)
    assert jnp.allclose(out_big, reference_forward_matched(x_big, padded, out_sz),
                        atol=1e-3, rtol=1e-3)
    assert jnp.allclose(out_big, reference_forward_f32(x_big, params),
                        atol=5e-2, rtol=5e-2)

    print("KERNEL_OK")
</pallas_src>

<mosaic_0001>
module attributes {stable_mosaic.version = 11 : i64} {
  func.func @mlp_kernel(%arg0: i32, %arg1: memref<8x784xbf16, #tpu.memory_space<vmem>>, %arg2: memref<784x128xbf16, #tpu.memory_space<vmem>>, %arg3: memref<1x128xf32, #tpu.memory_space<vmem>>, %arg4: memref<128x128xbf16, #tpu.memory_space<vmem>>, %arg5: memref<1x128xf32, #tpu.memory_space<vmem>>, %arg6: memref<128x128xbf16, #tpu.memory_space<vmem>>, %arg7: memref<1x128xf32, #tpu.memory_space<vmem>>, %arg8: memref<8x128xf32, #tpu.memory_space<vmem>>) attributes {dimension_semantics = [#tpu.dimension_semantics<parallel>], iteration_bounds = array<i64: 1>, scalar_prefetch = 0 : i64, scratch_operands = 0 : i64, tpu.core_type = #tpu.core_type<tc>, window_params = [{transform_indices = @transform_0, window_bounds = array<i64: 8, 784>}, {pipeline_mode = #tpu.pipeline_mode<synchronous>, transform_indices = @transform_1, window_bounds = array<i64: 784, 128>}, {pipeline_mode = #tpu.pipeline_mode<synchronous>, transform_indices = @transform_2, window_bounds = array<i64: 1, 128>}, {pipeline_mode = #tpu.pipeline_mode<synchronous>, transform_indices = @transform_3, window_bounds = array<i64: 128, 128>}, {pipeline_mode = #tpu.pipeline_mode<synchronous>, transform_indices = @transform_4, window_bounds = array<i64: 1, 128>}, {pipeline_mode = #tpu.pipeline_mode<synchronous>, transform_indices = @transform_5, window_bounds = array<i64: 128, 128>}, {pipeline_mode = #tpu.pipeline_mode<synchronous>, transform_indices = @transform_6, window_bounds = array<i64: 1, 128>}, {transform_indices = @transform_7, window_bounds = array<i64: 8, 128>}]} {
    %c0 = arith.constant 0 : index
    %c0_0 = arith.constant 0 : index
    %0 = vector.load %arg1[%c0, %c0_0] : memref<8x784xbf16, #tpu.memory_space<vmem>>, vector<8x784xbf16>
    %c0_1 = arith.constant 0 : index
    %c0_2 = arith.constant 0 : index
    %1 = vector.load %arg2[%c0_1, %c0_2] : memref<784x128xbf16, #tpu.memory_space<vmem>>, vector<784x128xbf16>
    %cst = arith.constant dense<0.000000e+00> : vector<8x128xf32>
    %2 = tpu.matmul %0, %1, %cst {dimension_numbers = #tpu.dot_dimension_numbers<[1], [0], [0], [1], [0, 0, 1, 1], [], []>} : vector<8x784xbf16>, vector<784x128xbf16>, vector<8x128xf32> -> vector<8x128xf32>
    %c0_3 = arith.constant 0 : index
    %c0_4 = arith.constant 0 : index
    %3 = vector.load %arg3[%c0_3, %c0_4] : memref<1x128xf32, #tpu.memory_space<vmem>>, vector<1x128xf32>
    %4 = vector.broadcast %3 : vector<1x128xf32> to vector<8x128xf32>
    %5 = arith.addf %2, %4 : vector<8x128xf32>
    %cst_5 = arith.constant 0.000000e+00 : f32
    %6 = vector.broadcast %cst_5 : f32 to vector<8x128xf32>
    %7 = arith.maximumf %5, %6 : vector<8x128xf32>
    %8 = arith.truncf %7 : vector<8x128xf32> to vector<8x128xbf16>
    %c0_6 = arith.constant 0 : index
    %c0_7 = arith.constant 0 : index
    %9 = vector.load %arg4[%c0_6, %c0_7] : memref<128x128xbf16, #tpu.memory_space<vmem>>, vector<128x128xbf16>
    %cst_8 = arith.constant dense<0.000000e+00> : vector<8x128xf32>
    %10 = tpu.matmul %8, %9, %cst_8 {dimension_numbers = #tpu.dot_dimension_numbers<[1], [0], [0], [1], [0, 0, 1, 1], [], []>} : vector<8x128xbf16>, vector<128x128xbf16>, vector<8x128xf32> -> vector<8x128xf32>
    %c0_9 = arith.constant 0 : index
    %c0_10 = arith.constant 0 : index
    %11 = vector.load %arg5[%c0_9, %c0_10] : memref<1x128xf32, #tpu.memory_space<vmem>>, vector<1x128xf32>
    %12 = vector.broadcast %11 : vector<1x128xf32> to vector<8x128xf32>
    %13 = arith.addf %10, %12 : vector<8x128xf32>
    %cst_11 = arith.constant 0.000000e+00 : f32
    %14 = vector.broadcast %cst_11 : f32 to vector<8x128xf32>
    %15 = arith.maximumf %13, %14 : vector<8x128xf32>
    %16 = arith.truncf %15 : vector<8x128xf32> to vector<8x128xbf16>
    %c0_12 = arith.constant 0 : index
    %c0_13 = arith.constant 0 : index
    %17 = vector.load %arg6[%c0_12, %c0_13] : memref<128x128xbf16, #tpu.memory_space<vmem>>, vector<128x128xbf16>
    %cst_14 = arith.constant dense<0.000000e+00> : vector<8x128xf32>
    %18 = tpu.matmul %16, %17, %cst_14 {dimension_numbers = #tpu.dot_dimension_numbers<[1], [0], [0], [1], [0, 0, 1, 1], [], []>} : vector<8x128xbf16>, vector<128x128xbf16>, vector<8x128xf32> -> vector<8x128xf32>
    %c0_15 = arith.constant 0 : index
    %c0_16 = arith.constant 0 : index
    %19 = vector.load %arg7[%c0_15, %c0_16] : memref<1x128xf32, #tpu.memory_space<vmem>>, vector<1x128xf32>
    %20 = vector.broadcast %19 : vector<1x128xf32> to vector<8x128xf32>
    %21 = arith.addf %18, %20 : vector<8x128xf32>
    %22 = tpu.iota {dimensions = array<i32: 1>} : vector<8x128xi32>
    %c10_i32 = arith.constant 10 : i32
    %23 = vector.broadcast %c10_i32 : i32 to vector<8x128xi32>
    %24 = arith.cmpi slt, %22, %23 : vector<8x128xi32>
    %cst_17 = arith.constant 0xFF800000 : f32
    %25 = vector.broadcast %cst_17 : f32 to vector<8x128xf32>
    %26 = arith.select %24, %21, %25 : vector<8x128xi1>, vector<8x128xf32>
    %cst_18 = arith.constant dense<0xFF800000> : vector<8xf32>
    %27 = vector.multi_reduction <maximumf>, %26, %cst_18 [1] : vector<8x128xf32> to vector<8xf32>
    %28 = vector.shape_cast %27 : vector<8xf32> to vector<8x1xf32>
    %29 = vector.broadcast %28 : vector<8x1xf32> to vector<8x128xf32>
    %30 = arith.subf %26, %29 : vector<8x128xf32>
    %31 = math.exp %30 : vector<8x128xf32>
    %cst_19 = arith.constant dense<0.000000e+00> : vector<8xf32>
    %32 = vector.multi_reduction <add>, %31, %cst_19 [1] : vector<8x128xf32> to vector<8xf32>
    %33 = vector.shape_cast %32 : vector<8xf32> to vector<8x1xf32>
    %34 = math.log %33 : vector<8x1xf32>
    %35 = vector.broadcast %34 : vector<8x1xf32> to vector<8x128xf32>
    %36 = arith.subf %30, %35 : vector<8x128xf32>
    %c0_20 = arith.constant 0 : index
    %c0_21 = arith.constant 0 : index
    %37 = vector.load %arg8[%c0_20, %c0_21] : memref<8x128xf32, #tpu.memory_space<vmem>>, vector<8x128xf32>
    tpu.vector_store %arg8[%c0_20, %c0_21], %36 {strides = array<i32>} : memref<8x128xf32, #tpu.memory_space<vmem>>, vector<8x128xf32>,
    return
  }
  func.func @transform_0(%arg0: i32) -> (i32, i32) {
    %c0_i32 = arith.constant 0 : i32
    %c0_i32_0 = arith.constant 0 : i32
    return %arg0, %c0_i32 : i32, i32
  }
  func.func @transform_1(%arg0: i32) -> (i32, i32) {
    %c0_i32 = arith.constant 0 : i32
    %c0_i32_0 = arith.constant 0 : i32
    %c0_i32_1 = arith.constant 0 : i32
    return %c0_i32, %c0_i32_0 : i32, i32
  }
  func.func @transform_2(%arg0: i32) -> (i32, i32) {
    %c0_i32 = arith.constant 0 : i32
    %c0_i32_0 = arith.constant 0 : i32
    %c0_i32_1 = arith.constant 0 : i32
    return %c0_i32, %c0_i32_0 : i32, i32
  }
  func.func @transform_3(%arg0: i32) -> (i32, i32) {
    %c0_i32 = arith.constant 0 : i32
    %c0_i32_0 = arith.constant 0 : i32
    %c0_i32_1 = arith.constant 0 : i32
    return %c0_i32, %c0_i32_0 : i32, i32
  }
  func.func @transform_4(%arg0: i32) -> (i32, i32) {
    %c0_i32 = arith.constant 0 : i32
    %c0_i32_0 = arith.constant 0 : i32
    %c0_i32_1 = arith.constant 0 : i32
    return %c0_i32, %c0_i32_0 : i32, i32
  }
  func.func @transform_5(%arg0: i32) -> (i32, i32) {
    %c0_i32 = arith.constant 0 : i32
    %c0_i32_0 = arith.constant 0 : i32
    %c0_i32_1 = arith.constant 0 : i32
    return %c0_i32, %c0_i32_0 : i32, i32
  }
  func.func @transform_6(%arg0: i32) -> (i32, i32) {
    %c0_i32 = arith.constant 0 : i32
    %c0_i32_0 = arith.constant 0 : i32
    %c0_i32_1 = arith.constant 0 : i32
    return %c0_i32, %c0_i32_0 : i32, i32
  }
  func.func @transform_7(%arg0: i32) -> (i32, i32) {
    %c0_i32 = arith.constant 0 : i32
    %c0_i32_0 = arith.constant 0 : i32
    return %arg0, %c0_i32 : i32, i32
  }
}

</mosaic_0001>

<bundles_post_ra>
// kernel: tpu_custom_call.1
= control target key start
LH: loop header
LB: loop body
LE: loop exit
PB: predicated region body
PF: predicated region fallthrough
CT: control target
= control target key end

     0   :  { %12 = vsyncpa [#allocation3], 0  ;;  %s1491_s0 = inlined_call_operand.hbm [shape: bf16[8,784], index: 0, kind: input, shape index: {}]   ;;  %s1492_s1 = inlined_call_operand.hbm [shape: bf16[784,128], index: 1, kind: input, shape index: {}]   ;;  %s1493_s2 = inlined_call_operand.vmem [shape: f32[1,128], index: 2, kind: input, shape index: {}]   ;;  %s1494_s3 = inlined_call_operand.hbm [shape: bf16[128,128], index: 3, kind: input, shape index: {}]   ;;  %s1495_s4 = inlined_call_operand.vmem [shape: f32[1,128], index: 4, kind: input, shape index: {}]   ;;  %s1496_s5 = inlined_call_operand.hbm [shape: bf16[128,128], index: 5, kind: input, shape index: {}]   ;;  %s1497_s6 = inlined_call_operand.vmem [shape: f32[1,128], index: 6, kind: input, shape index: {}]   ;;  %s1498_s7 = inlined_call_operand.hbm [shape: f32[8,128], index: 7, kind: output, shape index: {}]  }
   0x1   :  { %13 = vsyncpa [#allocation6], 0 }
   0x2   :  { %14 = vsyncpa [#allocation9], 0 }
   0x3   :  { %15 = vsyncpa [#allocation4], 0  ;;  %s1341_s24 = smov [#allocation5]   ;;  %s1223_s28 = scalar_lea.hbm %s1492_s1, 6272 }
   0x4   :  { %s31_s25 = sshll.u32 %s1341_s24, 4  ;;  %p1224_p0 = scmp.ne.s32.totalorder %s1492_s1, %s1223_s28  ;;  %s32_s25 = int_to_ptr.vmem [resolvable:$true] %s31_s25 }
   0x5   :  { %p1227_p1 = scmp.lt.u32.totalorder %s1223_s28, %s1492_s1 }
   0x7   :  { %p1229_p2 = pnand %p1227_p1, %p1224_p0 }
   0x9   :  { %1232 = shalt.err (!%p1229_p2)
}
   0xa   :  { %s1233_s10 = scalar_lea.vmem %s32_s25, 6272  ;;  %p1238_p4 = scmp.lt.s32.totalorder %s32_s25, %s32_s25 }
   0xb   :  { %p1234_p3 = scmp.ne.s32.totalorder %s32_s25, %s1233_s10  ;;  %p1239_p5 = scmp.lt.s32.totalorder %s1233_s10, %s1233_s10 }
   0xd   :  { %p1240_p6 = por %p1239_p5, %p1238_p4 }
   0xf   :  { %p1241_p7 = pnand %p1240_p6, %p1234_p3 }
  0x11   :  { %1244 = shalt.err (!%p1241_p7)
}
  0x12   :  { %s1342_s11 = smov 64   ;;  %s1343_s12 = smov 4  }
  0x13   :  { %37 = dma.hbm_to_vmem [thread:$0]  %s1492_s1, 6272, %s32_s25, [#allocation6], %s1342_s11, %s1342_s11, %s1343_s12  }
  0x14   :  { %s1344_s15 = smov [#allocation2]   ;;  %s1345_s17 = smov [#allocation7]  }
  0x15   :  { %s22_s16 = sshll.u32 %s1344_s15, 4  ;;  %s45_s18 = sshll.u32 %s1345_s17, 4  ;;  %s23_s16 = int_to_ptr.vmem [resolvable:$true] %s22_s16  ;;  %s46_s18 = int_to_ptr.vmem [resolvable:$true] %s45_s18 }
  0x16   :  { %s1245_s21 = scalar_lea.hbm %s1491_s0, 448 }
  0x17   :  { %p1246_p8 = scmp.ne.s32.totalorder %s1491_s0, %s1245_s21  ;;  %p1249_p9 = scmp.lt.u32.totalorder %s1245_s21, %s1491_s0 }
  0x19   :  { %p1251_p10 = pnand %p1249_p9, %p1246_p8 }
  0x1b   :  { %1254 = shalt.err (!%p1251_p10)
}
  0x1c   :  { %s1255_s1 = scalar_lea.vmem %s23_s16, 448  ;;  %p1260_p12 = scmp.lt.s32.totalorder %s23_s16, %s23_s16 }
  0x1d   :  { %p1256_p11 = scmp.ne.s32.totalorder %s23_s16, %s1255_s1  ;;  %p1261_p13 = scmp.lt.s32.totalorder %s1255_s1, %s1255_s1 }
  0x1f   :  { %p1262_p0 = por %p1261_p13, %p1260_p12 }
  0x21   :  { %p1263_p1 = pnand %p1262_p0, %p1256_p11 }
  0x23   :  { %1266 = shalt.err (!%p1263_p1)
}
  0x24   :  { %25 = dma.hbm_to_vmem [thread:$0]  %s1491_s0, 448, %s23_s16, [#allocation3]  }
  0x25   :  { %s1267_s30 = scalar_lea.hbm %s1494_s3, 1024 }
  0x26   :  { %p1268_p2 = scmp.ne.s32.totalorder %s1494_s3, %s1267_s30  ;;  %p1271_p3 = scmp.lt.u32.totalorder %s1267_s30, %s1494_s3 }
  0x28   :  { %p1273_p4 = pnand %p1271_p3, %p1268_p2 }
  0x2a   :  { %1276 = shalt.err (!%p1273_p4)
}
  0x2b   :  { %s1277_s14 = scalar_lea.vmem %s46_s18, 1024  ;;  %p1282_p6 = scmp.lt.s32.totalorder %s46_s18, %s46_s18 }
  0x2c   :  { %p1278_p5 = scmp.ne.s32.totalorder %s46_s18, %s1277_s14  ;;  %p1283_p7 = scmp.lt.s32.totalorder %s1277_s14, %s1277_s14 }
  0x2e   :  { %p1284_p8 = por %p1283_p7, %p1282_p6 }
  0x30   :  { %p1285_p9 = pnand %p1284_p8, %p1278_p5 }
  0x32   :  { %1288 = shalt.err (!%p1285_p9)
}
  0x33   :  { %51 = dma.hbm_to_vmem [thread:$0]  %s1494_s3, 1024, %s46_s18, [#allocation6], %s1342_s11, %s1342_s11, %s1343_s12  }
  0x34   :  { %s1346_s16 = smov [#allocation8]   ;;  %s1289_s21 = scalar_lea.hbm %s1496_s5, 1024 }
  0x35   :  { %s59_s17 = sshll.u32 %s1346_s16, 4  ;;  %p1290_p10 = scmp.ne.s32.totalorder %s1496_s5, %s1289_s21  ;;  %s60_s17 = int_to_ptr.vmem [resolvable:$true] %s59_s17 }
  0x36   :  { %p1293_p11 = scmp.lt.u32.totalorder %s1289_s21, %s1496_s5 }
  0x38   :  { %p1295_p12 = pnand %p1293_p11, %p1290_p10 }
  0x3a   :  { %1298 = shalt.err (!%p1295_p12)
}
  0x3b   :  { %s1299_s1 = scalar_lea.vmem %s60_s17, 1024  ;;  %p1304_p0 = scmp.lt.s32.totalorder %s60_s17, %s60_s17 }
  0x3c   :  { %p1300_p13 = scmp.ne.s32.totalorder %s60_s17, %s1299_s1  ;;  %p1305_p1 = scmp.lt.s32.totalorder %s1299_s1, %s1299_s1 }
  0x3e   :  { %p1306_p2 = por %p1305_p1, %p1304_p0 }
  0x40   :  { %p1307_p3 = pnand %p1306_p2, %p1300_p13 }
  0x42   :  { %1310 = shalt.err (!%p1307_p3)
}
  0x43   :  { %65 = dma.hbm_to_vmem [thread:$0]  %s1496_s5, 1024, %s60_s17, [#allocation9], %s1342_s11, %s1342_s11, %s1343_s12  }
  0x44   :  { %1333 = dma.done.wait [#allocation3], 448  }
  0x45   :  { %1334 = vsyncadd [#allocation3], 4294966848 }
  0x46   :  { %1335 = dma.done.wait [#allocation6], 7296  }
  0x47   :  { %1336 = vsyncadd [#allocation6], 4294960000 }
  0x48   :  { %1337 = dma.done.wait [#allocation9], 1024  }
  0x49   :  { %1338 = vsyncadd [#allocation9], 4294966272  ;;  %v1147_v0 = vld [vmem:[#allocation5 + $0x40] sm:$0xff]   ;;  %v1151_v4 = vld [vmem:[#allocation5 + $0x48] sm:$0xff]   ;;  %v1347_v43 = vmov 0.0   ;;  %vm1348_vm0 = vmmov 0  }
  0x4a   :  { %v1148_v1 = vld [vmem:[#allocation5] sm:$0xff]   ;;  %1006 = vmatprep.subr.bf16.mxu0 %v1147_v0  ;;  %v1152_v5 = vld [vmem:[#allocation5 + $0x8] sm:$0xff]   ;;  %v1155_v8 = vld [vmem:[#allocation5 + $0x50] sm:$0xff]   ;;  %vm508_vm1 = vcmask 130048  }
  0x4b   :  { %v1149_v2 = vld [vmem:[#allocation5 + $0xc0] sm:$0xff]   ;;  %1007 = vmatpush3.bf16.msra.mxu0 %v1148_v1  ;;  %v1153_v6 = vld [vmem:[#allocation5 + $0xc8] sm:$0xff]   ;;  %v1156_v9 = vld [vmem:[#allocation5 + $0x10] sm:$0xff]  }
  0x4c   :  { %v1150_v3 = vld [vmem:[#allocation5 + $0x80] sm:$0xff]   ;;  %1028 = vmatprep.subr.bf16.mxu1 %v1149_v2  ;;  %1008 = vmatprep.subr.bf16.mxu0 %v1151_v4  ;;  %v1154_v7 = vld [vmem:[#allocation5 + $0x88] sm:$0xff]   ;;  %v1157_v10 = vld [vmem:[#allocation5 + $0xd0] sm:$0xff]  }
  0x4d   :  { %1029 = vmatpush3.bf16.msra.mxu1 %v1150_v3  ;;  %v1158_v11 = vld [vmem:[#allocation5 + $0x90] sm:$0xff]   ;;  %v1159_v12 = vld [vmem:[#allocation5 + $0x58] sm:$0xff]   ;;  %v1163_v16 = vld [vmem:[#allocation5 + $0x60] sm:$0xff]  }
  0x4e   :  { %1030 = vmatprep.subr.bf16.mxu1 %v1153_v6  ;;  %v1160_v13 = vld [vmem:[#allocation5 + $0x18] sm:$0xff]   ;;  %v1164_v17 = vld [vmem:[#allocation5 + $0x20] sm:$0xff]   ;;  %v1167_v20 = vld [vmem:[#allocation5 + $0x68] sm:$0xff]  }
  0x4f   :  { %1009 = vmatpush3.bf16.msra.mxu0 %v1152_v5  ;;  %v1161_v14 = vld [vmem:[#allocation5 + $0xd8] sm:$0xff]   ;;  %v1165_v18 = vld [vmem:[#allocation5 + $0xe0] sm:$0xff]   ;;  %v1168_v21 = vld [vmem:[#allocation5 + $0x28] sm:$0xff]  }
  0x50   :  { %1010 = vmatprep.subr.bf16.mxu0 %v1155_v8  ;;  %v1162_v15 = vld [vmem:[#allocation5 + $0x98] sm:$0xff]   ;;  %v1166_v19 = vld [vmem:[#allocation5 + $0xa0] sm:$0xff]   ;;  %v1169_v22 = vld [vmem:[#allocation5 + $0xe8] sm:$0xff]  }
  0x51   :  { %1031 = vmatpush3.bf16.msra.mxu1 %v1154_v7  ;;  %v1170_v23 = vld [vmem:[#allocation5 + $0xa8] sm:$0xff]   ;;  %v1171_v24 = vld [vmem:[#allocation5 + $0x70] sm:$0xff]   ;;  %v1175_v28 = vld [vmem:[#allocation5 + $0x78] sm:$0xff]  }
  0x52   :  { %1032 = vmatprep.subr.bf16.mxu1 %v1157_v10  ;;  %v1172_v25 = vld [vmem:[#allocation5 + $0x30] sm:$0xff]   ;;  %v1176_v29 = vld [vmem:[#allocation5 + $0x38] sm:$0xff]   ;;  %v81_v31 = vld [vmem:[#allocation2] sm:$0xff] }
  0x53   :  { %1011 = vmatpush3.bf16.msra.mxu0 %v1156_v9  ;;  %v1173_v26 = vld [vmem:[#allocation5 + $0xf0] sm:$0xff]   ;;  %v1177_v30 = vld [vmem:[#allocation5 + $0xf8] sm:$0xff]   ;;  %v931_v32 = vcombine.low %v81_v31, %v81_v31  ;;  %v932_v33 = vcombine.high %v81_v31, %v81_v31  ;;  %v1181_v35 = vld [vmem:[#allocation5 + $0x140] sm:$0xff]  }
  0x54   :  { %1012 = vmatprep.subr.bf16.mxu0 %v1159_v12  ;;  %v1174_v27 = vld [vmem:[#allocation5 + $0xb0] sm:$0xff]   ;;  %v1180_v34 = vld [vmem:[#allocation5 + $0xb8] sm:$0xff]   ;;  %v1184_v39 = vld [vmem:[#allocation5 + $0x100] sm:$0xff]  }
  0x55   :  { %1033 = vmatpush3.bf16.msra.mxu1 %v1158_v11  ;;  %v82_v36 = vld [vmem:[#allocation2 + $0x8] sm:$0xff]  ;;  %544 = vmatprep.mubr.bf16.mxu0 %v932_v33  ;;  %v1189_v45 = vld [vmem:[#allocation5 + $0x158] sm:$0xff]   ;;  %v1191_v47 = vld [vmem:[#allocation5 + $0x160] sm:$0xff]  }
  0x56   :  { %1034 = vmatprep.subr.bf16.mxu1 %v1161_v14  ;;  %v933_v37 = vcombine.low %v82_v36, %v82_v36  ;;  %v934_v38 = vcombine.high %v82_v36, %v82_v36  ;;  %v1185_v40 = vld [vmem:[#allocation5 + $0x148] sm:$0xff]   ;;  %v1187_v42 = vld [vmem:[#allocation5 + $0x150] sm:$0xff]   ;;  %v1190_v46 = vld [vmem:[#allocation5 + $0x118] sm:$0xff]  }
  0x57   :  { %1013 = vmatpush3.bf16.msra.mxu0 %v1160_v13  ;;  %v1186_v41 = vld [vmem:[#allocation5 + $0x108] sm:$0xff]   ;;  %v1188_v44 = vld [vmem:[#allocation5 + $0x110] sm:$0xff]   ;;  %v1192_v48 = vld [vmem:[#allocation5 + $0x120] sm:$0xff]  }
  0x58   :  { %1014 = vmatprep.subr.bf16.mxu0 %v1163_v16  ;;  %584 = vmatprep.mubr.bf16.mxu1 %v934_v38  ;;  %v1193_v49 = vld [vmem:[#allocation5 + $0x168] sm:$0xff]   ;;  %v1199_v50 = vld [vmem:[#allocation5 + $0x180] sm:$0xff]   ;;  %v83_v51 = vld [vmem:[#allocation2 + $0x10] sm:$0xff] }
  0x59   :  { %1035 = vmatpush3.bf16.msra.mxu1 %v1162_v15  ;;  %v1194_v52 = vld [vmem:[#allocation5 + $0x128] sm:$0xff]   ;;  %v936_v53 = vcombine.high %v83_v51, %v83_v51  ;;  %v1202_v54 = vld [vmem:[#allocation2 + $0x18] ss:$0 sps:$4 sm:$0xff]   ;;  %v1195_v55 = vld [vmem:[#allocation5 + $0x170] sm:$0xff]   ;;  %v935_v59 = vcombine.low %v83_v51, %v83_v51 }
  0x5a   :  { %1036 = vmatprep.subr.bf16.mxu1 %v1165_v18  ;;  %v1196_v56 = vld [vmem:[#allocation5 + $0x130] sm:$0xff]   ;;  %v1197_v57 = vld [vmem:[#allocation5 + $0x178] sm:$0xff]   ;;  %v1203_v60 = vld [vmem:[#allocation7] sm:$0xff]  }
  0x5b   :  { %1015 = vmatpush3.bf16.msra.mxu0 %v1164_v17  ;;  %v1198_v58 = vld [vmem:[#allocation5 + $0x138] sm:$0xff]   ;;  %v1204_v61 = vld [vmem:[#allocation7 + $0x8] sm:$0xff]   ;;  %v1206_v63 = vld [vmem:[#allocation7 + $0x18] sm:$0xff]  }
  0x5c   :  { %1016 = vmatprep.subr.bf16.mxu0 %v1167_v20  ;;  %v1205_v62 = vld [vmem:[#allocation7 + $0x10] sm:$0xff]   ;;  %v1207_v0 = vld [vmem:[#allocation7 + $0x20] sm:$0xff]   ;;  %v1208_v1 = vld [vmem:[#allocation7 + $0x28] sm:$0xff]  }
  0x5d   :  { %1037 = vmatpush3.bf16.msra.mxu1 %v1166_v19  ;;  %v1209_v2 = vld [vmem:[#allocation7 + $0x30] sm:$0xff]   ;;  %v1210_v3 = vld [vmem:[#allocation7 + $0x38] sm:$0xff]   ;;  %v1211_v4 = vld [vmem:[#allocation8] sm:$0xff]  }
  0x5e   :  { %1038 = vmatprep.subr.bf16.mxu1 %v1169_v22  ;;  %v1212_v5 = vld [vmem:[#allocation8 + $0x8] sm:$0xff]   ;;  %v1213_v6 = vld [vmem:[#allocation8 + $0x10] sm:$0xff]   ;;  %v1214_v7 = vld [vmem:[#allocation8 + $0x18] sm:$0xff]  }
  0x5f   :  { %1017 = vmatpush3.bf16.msra.mxu0 %v1168_v21  ;;  %v1215_v8 = vld [vmem:[#allocation8 + $0x20] sm:$0xff]   ;;  %v1216_v9 = vld [vmem:[#allocation8 + $0x28] sm:$0xff]   ;;  %v930_v11 = vld [vmem:[%s1493_s2] ss:$0 sm:$0xff] }
  0x60   :  { %1018 = vmatprep.subr.bf16.mxu0 %v1171_v24  ;;  %v1217_v36 = vld [vmem:[#allocation8 + $0x30] sm:$0xff]   ;;  %v988_v38 = vld [vmem:[%s1495_s4] ss:$0 sm:$0xff]  ;;  %s1349_s4 = smov [#allocation10]  }
  0x61   :  { %1039 = vmatpush3.bf16.msra.mxu1 %v1170_v23  ;;  %s919_s28 = sshll.u32 %s1349_s4, 4  ;;  %s920_s28 = int_to_ptr.vmem [resolvable:$true] %s919_s28 }
  0x62   :  { %1040 = vmatprep.subr.bf16.mxu1 %v1173_v26  ;;  %p1316_p5 = scmp.lt.s32.totalorder %s920_s28, %s920_s28 }
  0x63   :  { %1019 = vmatpush3.bf16.msra.mxu0 %v1172_v25 }
  0x64   :  { %1020 = vmatprep.subr.bf16.mxu0 %v1175_v28 }
  0x65   :  { %1041 = vmatpush3.bf16.msra.mxu1 %v1174_v27 }
  0x66   :  { %1042 = vmatprep.subr.bf16.mxu1 %v1177_v30 }
  0x67   :  { %1021 = vmatpush3.bf16.msra.mxu0 %v1176_v29 }
  0x68   :  { %1050 = vmatprep.subr.bf16.mxu0 %v1181_v35 }
  0x69   :  { %1043 = vmatpush3.bf16.msra.mxu1 %v1180_v34 }
  0x6a   :  { %545 = vmatmul.mubr.bf16.vlgmr.msra.gmra.mrb[0].mxu0 %v931_v32  ;;  %1092 = vmatprep.subr.bf16.mxu1 %v1347_v43 }
  0x6b   :  { %1051 = vmatpush3.bf16.msra.mxu0 %v1184_v39  ;;  %624 = vmatprep.mubr.bf16.mxu0 %v936_v53 }
  0x6c   :  { %585 = vmatmul.mubr.bf16.vlgmr.msra.gmra.mrb[0].mxu1 %v933_v37  ;;  %1052 = vmatprep.subr.bf16.mxu0 %v1185_v40  ;;  %v1218_v37 = vld [vmem:[#allocation8 + $0x38] sm:$0xff]  }
  0x6d   :  { %1094 = vmatprep.mubr.msk.bf16.mxu1 %vm1348_vm0, %v1347_v43  ;;  %1093 = vmatpush3.bf16.msra.mxu1 %v1199_v50 }
  0x6e   :  { %1098 = vmatprep.subr.bf16.mxu1 %v1347_v43 }
  0x6f   :  { %1053 = vmatpush3.bf16.msra.mxu0 %v1186_v41 }
  0x70   :  { %1054 = vmatprep.subr.bf16.mxu0 %v1187_v42 }
  0x73   :  { %1055 = vmatpush3.bf16.msra.mxu0 %v1188_v44 }
  0x74   :  { %1056 = vmatprep.subr.bf16.mxu0 %v1189_v45  ;;  %1095 = vmatmul.mubr.msk.bf16.vlgmr.msra.gmra.mrb[4].mxu1 %vm508_vm1, %v1202_v54 }
  0x75   :  { %1114 = vmatprep.mubr.msk.bf16.mxu1 %vm1348_vm0, %v1347_v43  ;;  %1099 = vmatpush3.bf16.msra.mxu1 %v1203_v60 }
  0x76   :  { %1100 = vmatprep.subr.bf16.mxu1 %v1347_v43 }
  0x77   :  { %1057 = vmatpush3.bf16.msra.mxu0 %v1190_v46 }
  0x78   :  { %1058 = vmatprep.subr.bf16.mxu0 %v1191_v47  ;;  %v898_v47 = vlaneseq }
  0x79   :  { %1101 = vmatpush3.bf16.msra.mxu1 %v1204_v61 }
  0x7a   :  { %1102 = vmatprep.subr.bf16.mxu1 %v1347_v43 }
  0x7b   :  { %1059 = vmatpush3.bf16.msra.mxu0 %v1192_v48  ;;  %v899_v48 = vand.u32 127, %v898_v47 }
  0x7c   :  { %1060 = vmatprep.subr.bf16.mxu0 %v1193_v49 }
  0x7d   :  { %1103 = vmatpush3.bf16.msra.mxu1 %v1205_v62  ;;  %vm900_vm2 = vcmp.lt.s32.totalorder %v899_v48, 10 }
  0x7e   :  { %1104 = vmatprep.subr.bf16.mxu1 %v1347_v43 }
  0x7f   :  { %1061 = vmatpush3.bf16.msra.mxu0 %v1194_v52 }
  0x80   :  { %1062 = vmatprep.subr.bf16.mxu0 %v1195_v55 }
  0x81   :  { %1105 = vmatpush3.bf16.msra.mxu1 %v1206_v63 }
  0x82   :  { %1106 = vmatprep.subr.bf16.mxu1 %v1347_v43 }
  0x83   :  { %1063 = vmatpush3.bf16.msra.mxu0 %v1196_v56 }
  0x84   :  { %1064 = vmatprep.subr.bf16.mxu0 %v1197_v57 }
  0x85   :  { %1107 = vmatpush3.bf16.msra.mxu1 %v1207_v0 }
  0x86   :  { %1108 = vmatprep.subr.bf16.mxu1 %v1347_v43 }
  0x87   :  { %1065 = vmatpush3.bf16.msra.mxu0 %v1198_v58 }
  0x88   :  { %1118 = vmatprep.subr.bf16.mxu0 %v1347_v43 }
  0x89   :  { %1109 = vmatpush3.bf16.msra.mxu1 %v1208_v1 }
  0x8a   :  { %625 = vmatmul.mubr.bf16.vlgmr.msra.gmra.mrb[4].mxu0 %v935_v59  ;;  %1110 = vmatprep.subr.bf16.mxu1 %v1347_v43 }
  0x8b   :  { %1134 = vmatprep.mubr.msk.bf16.mxu0 %vm1348_vm0, %v1347_v43  ;;  %1119 = vmatpush3.bf16.msra.mxu0 %v1211_v4 }
  0x8c   :  { %1120 = vmatprep.subr.bf16.mxu0 %v1347_v43 }
  0x8d   :  { %1111 = vmatpush3.bf16.msra.mxu1 %v1209_v2 }
  0x8e   :  { %1112 = vmatprep.subr.bf16.mxu1 %v1347_v43 }
  0x8f   :  { %1121 = vmatpush3.bf16.msra.mxu0 %v1212_v5 }
  0x90   :  { %1122 = vmatprep.subr.bf16.mxu0 %v1347_v43 }
  0x91   :  { %1113 = vmatpush3.bf16.msra.mxu1 %v1210_v3 }
  0x93   :  { %1123 = vmatpush3.bf16.msra.mxu0 %v1213_v6 }
  0x94   :  { %1124 = vmatprep.subr.bf16.mxu0 %v1347_v43 }
  0x97   :  { %1125 = vmatpush3.bf16.msra.mxu0 %v1214_v7 }
  0x98   :  { %1126 = vmatprep.subr.bf16.mxu0 %v1347_v43 }
  0x9b   :  { %1127 = vmatpush3.bf16.msra.mxu0 %v1215_v8 }
  0x9c   :  { %1128 = vmatprep.subr.bf16.mxu0 %v1347_v43 }
  0x9f   :  { %1129 = vmatpush3.bf16.msra.mxu0 %v1216_v9 }
  0xa0   :  { %1130 = vmatprep.subr.bf16.mxu0 %v1347_v43 }
  0xa3   :  { %1131 = vmatpush3.bf16.msra.mxu0 %v1217_v36 }
  0xa4   :  { %1132 = vmatprep.subr.bf16.mxu0 %v1347_v43  ;;  %v997_v43 = vld [vmem:[%s1497_s6] ss:$0 sm:$0xff]  ;;  %s1311_s6 = scalar_lea.vmem %s920_s28, 128 }
  0xa5   :  { %p1312_p4 = scmp.ne.s32.totalorder %s920_s28, %s1311_s6  ;;  %p1317_p6 = scmp.lt.s32.totalorder %s1311_s6, %s1311_s6 }
  0xa7   :  { %1133 = vmatpush3.bf16.msra.mxu0 %v1218_v37  ;;  %p1318_p7 = por %p1317_p6, %p1316_p5 }
  0xa9   :  { %p1319_p8 = pnand %p1318_p7, %p1312_p4 }
 0x13d   :  { %v1022_v10 = vpop.f32.mrb[0].mxu0 }
 0x13e   :  { %v1023_v12 = vpop.f32.mrb[1].mxu0 }
 0x13f   :  { %v1024_v13 = vadd.f32 %v1023_v12, %v1022_v10  ;;  %v1025_v14 = vpop.f32.mrb[2].mxu0  ;;  %v1044_v15 = vpop.f32.mrb[0].mxu1 }
 0x140   :  { %v1026_v16 = vpop.f32.mrb[3].mxu0  ;;  %v1045_v17 = vpop.f32.mrb[1].mxu1 }
 0x141   :  { %v547_v18 = vadd.f32 %v1024_v13, %v930_v11  ;;  %v1046_v19 = vadd.f32 %v1045_v17, %v1044_v15  ;;  %v1047_v20 = vpop.f32.mrb[2].mxu1 }
 0x142   :  { %v1048_v21 = vpop.f32.mrb[3].mxu1 }
 0x143   :  { %v587_v22 = vadd.f32 %v1046_v19, %v547_v18 }
 0x147   :  { %v666_v23 = vpop.f32.mrb[4].mxu1 }
 0x148   :  { %v1096_v24 = vpop.f32.mrb[5].mxu1 }
 0x149   :  { %v669_v25 = vpop.f32.mrb[6].mxu1 }
 0x14a   :  { %v1097_v26 = vpop.f32.mrb[7].mxu1 }
 0x15d   :  { %v1066_v27 = vpop.f32.mrb[4].mxu0 }
 0x15e   :  { %v1067_v28 = vpop.f32.mrb[5].mxu0 }
 0x15f   :  { %v1068_v29 = vadd.f32 %v1067_v28, %v1066_v27  ;;  %v1069_v30 = vpop.f32.mrb[6].mxu0 }
 0x160   :  { %v1070_v31 = vpop.f32.mrb[7].mxu0 }
 0x161   :  { %v627_v32 = vadd.f32 %v1068_v29, %v587_v22 }
 0x163   :  { %v667_v33 = vadd.f32 %v666_v23, %v627_v32 }
 0x165   :  { %v672_v34 = vmax.f32 %v667_v33, 0.0 }
 0x167   :  { %v673_v35 = vpack.c.bf16 %v672_v34, %v672_v34 }
 0x169   :  { %1115 = vmatmul.mubr.bf16.vlgmr.msra.gmra.mrb[8].mxu1 %v673_v35 }
 0x23c   :  { %v779_v39 = vpop.f32.mrb[8].mxu1 }
 0x23d   :  { %v780_v40 = vadd.f32 %v988_v38, %v779_v39  ;;  %v1116_v41 = vpop.f32.mrb[9].mxu1 }
 0x23e   :  { %v782_v42 = vpop.f32.mrb[10].mxu1 }
 0x23f   :  { %v785_v44 = vmax.f32 %v780_v40, 0.0  ;;  %v1117_v45 = vpop.f32.mrb[11].mxu1 }
 0x241   :  { %v786_v46 = vpack.c.bf16 %v785_v44, %v785_v44 }
 0x243   :  { %1135 = vmatmul.mubr.bf16.vlgmr.msra.gmra.mrb[8].mxu0 %v786_v46 }
 0x316   :  { %v892_v49 = vpop.f32.mrb[8].mxu0 }
 0x317   :  { %v893_v50 = vadd.f32 %v997_v43, %v892_v49  ;;  %v1136_v51 = vpop.f32.mrb[9].mxu0 }
 0x318   :  { %v895_v52 = vpop.f32.mrb[10].mxu0 }
 0x319   :  { %v1137_v53 = vpop.f32.mrb[11].mxu0  ;;  %v901_v54 = vsel %vm900_vm2, %v893_v50, -inf }
 0x31a   :  { %902 = vmax.xlane.f32.xlu0 %v901_v54 }
 0x3a7   :  { %v903_v55 = vpop.xlane.xlu0 %902 }
 0x3a8   :  { %v904_v56 = vsub.f32 %v901_v54, %v903_v55 }
 0x3aa   :  { %v905_v57 = vmul.f32 1.442695, %v904_v56 }
 0x3ac   :  { %1219 = vpow2.f32 %v905_v57 }
 0x3b6   :  { %v1220_v58 = vpop.eup %1219 }
 0x3b7   :  { %907 = vadd.xlane.f32.xlu0 %v1220_v58 }
 0x444   :  { %v908_v59 = vpop.xlane.xlu0 %907 }
 0x445   :  { %1221 = vlog2.f32 %v908_v59 }
 0x44f   :  { %v1222_v60 = vpop.eup %1221 }
 0x450   :  { %v910_v61 = vmul.f32 0.6931472, %v1222_v60 }
 0x452   :  { %v911_v62 = vsub.f32 %v904_v56, %v910_v61 }
 0x454   :  { %912 = vst [vmem:[#allocation10] sm:$0xff] %v911_v62 }
 0x455   :  { %1322 = shalt.err (!%p1319_p8)
}
 0x456   :  { %s1323_s8 = scalar_lea.hbm %s1498_s7, 128 }
 0x457   :  { %p1324_p9 = scmp.ne.s32.totalorder %s1498_s7, %s1323_s8  ;;  %p1327_p10 = scmp.lt.u32.totalorder %s1323_s8, %s1498_s7 }
 0x459   :  { %p1329_p11 = pnand %p1327_p10, %p1324_p9 }
 0x45b   :  { %1332 = shalt.err (!%p1329_p11)
}
 0x45c   :  { %922 = dma.vmem_to_hbm [thread:$0]  %s920_s28, 128, %s1498_s7, [#allocation4]  }
 0x45d   :  { %1339 = dma.done.wait [#allocation4], 128  }
 0x45e   :  { %1340 = vsyncadd [#allocation4], 4294967168 }
 0x45f   :  { %926 = vsyncpa [#allocation3], 1 }
 0x460   :  { %927 = vsyncpa [#allocation6], 1 }
 0x461   :  { %928 = vsyncpa [#allocation9], 1 }
 0x462   :  { %929 = vsyncpa [#allocation4], 1 }

</bundles_post_ra>
